<compile_context>
chip_gen: v6e
topology: v6e:2x2x1
jax: 0.10.0
libtpu: 0.0.40
codegen_flags: <defaults>
</compile_context>

<pallas_src>
import functools

import jax
import jax.numpy as jnp
from jax import lax
from jax.experimental import pallas as pl
from jax.experimental.pallas import tpu as pltpu


def _lstm_namer_kernel(x_ref, wih_t_ref, whh_t_ref, b_ref, wlin_t_ref, blin_ref,
                       o_ref, *, seq_len):
    """One batch shard: LSTM recurrence + final linear + log_softmax, in VMEM.

    x_ref      : (S*TB, I)  rows ordered s-major, b-minor
    wih_t_ref  : (I, 4H)    pre-transposed input weights
    whh_t_ref  : (H, 4H)    pre-transposed recurrent weights
    b_ref      : (1, 4H)    b_ih + b_hh
    wlin_t_ref : (H, O)     pre-transposed output projection
    blin_ref   : (1, O)
    o_ref      : (TB, O)    log-probs of the last timestep per sequence
    """
    TB = o_ref.shape[0]
    H = whh_t_ref.shape[0]
    S = seq_len

    # Hoisted input projection for all (timestep, sequence) rows at once:
    # (S*TB, I) @ (I, 4H) + (1, 4H)  -- one MXU pass instead of S.
    x_proj = (jnp.dot(x_ref[...], wih_t_ref[...],
                      preferred_element_type=jnp.float32)
              + b_ref[...])                                     # (S*TB, 4H)

    whh_t = whh_t_ref[...]                                      # (H, 4H)

    # Lane mask selecting the tanh-activated "g" gate block (lanes [2H, 3H)).
    lane = lax.broadcasted_iota(jnp.int32, (1, 4 * H), 1)
    is_g = (lane >= 2 * H) & (lane < 3 * H)

    h = jnp.zeros((TB, H), jnp.float32)   # matches zero-init hidden_cell
    c = jnp.zeros((TB, H), jnp.float32)

    # Static trip count -> fully unrolled at trace time; h/c stay in vregs for
    # the whole recurrence (no scratch round-trips).
    for t in range(S):
        gates = x_proj[t * TB:(t + 1) * TB, :] + jnp.dot(
            h, whh_t, preferred_element_type=jnp.float32)       # (TB, 4H)
        # Single EUP pass per step: tanh(x) == 2*sigmoid(2x) - 1, so pre-double
        # the g lanes, run one sigmoid over the full vreg, fix up the g lanes.
        gates2 = jnp.where(is_g, 2.0 * gates, gates)
        sig = jax.nn.sigmoid(gates2)
        act = jnp.where(is_g, 2.0 * sig - 1.0, sig)
        i_g = act[:, 0 * H:1 * H]
        f_g = act[:, 1 * H:2 * H]
        g_g = act[:, 2 * H:3 * H]
        o_g = act[:, 3 * H:4 * H]
        c = f_g * c + i_g * g_g
        h = o_g * jnp.tanh(c)

    # linear(h_last) followed by log_softmax along the feature axis.
    logits = (jnp.dot(h, wlin_t_ref[...],
                      preferred_element_type=jnp.float32)
              + blin_ref[...])                                  # (TB, O)
    m = jnp.max(logits, axis=1, keepdims=True)
    lse = jnp.log(jnp.sum(jnp.exp(logits - m), axis=1, keepdims=True)) + m
    o_ref[...] = logits - lse


def prepare_lstm_params(w_ih, w_hh, b_ih, b_hh, w_lin, b_lin):
    """One-time parameter prep: pre-transpose / cast / fuse biases so the
    per-call path never pays for loop-invariant XLA transposes."""
    f32 = jnp.float32
    H = w_hh.shape[1]
    O = w_lin.shape[0]
    return dict(
        wih_t=jnp.asarray(w_ih, f32).T,                              # (I, 4H)
        whh_t=jnp.asarray(w_hh, f32).T,                              # (H, 4H)
        b=(jnp.asarray(b_ih, f32) + jnp.asarray(b_hh, f32)).reshape(1, 4 * H),
        wlin_t=jnp.asarray(w_lin, f32).T,                            # (H, O)
        blin=jnp.asarray(b_lin, f32).reshape(1, O),
    )


@jax.jit
def lstm_namer_forward_batched(x, params):
    """x: (B, S, I). Returns (B, O) = y[-1] per sequence (zero-init hidden)."""
    B, S, I = x.shape
    H = params["whh_t"].shape[0]
    O = params["wlin_t"].shape[1]
    f32 = jnp.float32

    # Shard the batch across grid steps (-> across v7x's two TensorCores via
    # dimension_semantics=("parallel",)); negligible overhead on 1-TC chips.
    # Keep the per-shard row count a multiple of 8 (sublane alignment / (8,128)
    # BlockSpec constraint on the output block).
    num_shards = 2 if (B % 16 == 0) else 1
    TB = B // num_shards

    # Per-shard row layout: (shard, s-major, b-minor) so each timestep's rows
    # are a contiguous, sublane-aligned static slice inside the kernel.
    x_sh = (x.astype(f32)
            .reshape(num_shards, TB, S, I)
            .transpose(0, 2, 1, 3)
            .reshape(num_shards, S * TB, I))

    cost = pl.CostEstimate(
        flops=2 * B * S * I * 4 * H + 2 * B * S * H * 4 * H + 2 * B * H * O,
        transcendentals=B * S * 5 * H + B * O,
        bytes_accessed=4 * (B * S * I + I * 4 * H + H * 4 * H + 4 * H
                            + H * O + O + B * O),
    )

    const = lambda i: (0, 0)   # weights: same block every grid step -> resident
    out = pl.pallas_call(
        functools.partial(_lstm_namer_kernel, seq_len=S),
        out_shape=jax.ShapeDtypeStruct((B, O), f32),
        grid=(num_shards,),
        in_specs=[
            pl.BlockSpec((None, S * TB, I), lambda i: (i, 0, 0)),
            pl.BlockSpec((I, 4 * H), const),
            pl.BlockSpec((H, 4 * H), const),
            pl.BlockSpec((1, 4 * H), const),
            pl.BlockSpec((H, O), const),
            pl.BlockSpec((1, O), const),
        ],
        out_specs=pl.BlockSpec((TB, O), lambda i: (i, 0)),
        compiler_params=pltpu.CompilerParams(
            dimension_semantics=("parallel",)),
        cost_estimate=cost,
    )(x_sh, params["wih_t"], params["whh_t"], params["b"],
      params["wlin_t"], params["blin"])
    return out


def lstm_namer_forward(x, params):
    """Single-sequence forward matching the torch module: x (S, I) -> (O,)."""
    return lstm_namer_forward_batched(x[None], params)[0]


if __name__ == "__main__":
    # Small shapes consistent with char-level name generation:
    # seq=8, in_size=27 (vocab), hidden=32, out=27; batch of 16 sequences.
    SEQ, IN, HID, OUT = 8, 27, 32, 27
    BATCH = 16

    key = jax.random.PRNGKey(0)
    ks = jax.random.split(key, 7)
    scale = 1.0 / jnp.sqrt(HID)

    x     = jax.random.normal(ks[0], (BATCH, SEQ, IN), dtype=jnp.float32)
    w_ih  = jax.random.uniform(ks[1], (4 * HID, IN),  minval=-scale, maxval=scale)
    w_hh  = jax.random.uniform(ks[2], (4 * HID, HID), minval=-scale, maxval=scale)
    b_ih  = jax.random.uniform(ks[3], (4 * HID,),     minval=-scale, maxval=scale)
    b_hh  = jax.random.uniform(ks[4], (4 * HID,),     minval=-scale, maxval=scale)
    w_lin = jax.random.uniform(ks[5], (OUT, HID),     minval=-scale, maxval=scale)
    b_lin = jax.random.uniform(ks[6], (OUT,),         minval=-scale, maxval=scale)

    params = prepare_lstm_params(w_ih, w_hh, b_ih, b_hh, w_lin, b_lin)

    # Batched path: B sequences in one pallas_call, weights resident in VMEM.
    y_batched = lstm_namer_forward_batched(x, params)
    jax.block_until_ready(y_batched)

    # Single-sequence path == the torch module's forward(x) with fresh hidden.
    y_single = lstm_namer_forward(x[0], params)
    jax.block_until_ready(y_single)

    # Pure-JAX reference (exact torch math: separate sigmoid/tanh gate blocks).
    def ref_one(xs):
        h = jnp.zeros((1, HID), jnp.float32)
        c = jnp.zeros((1, HID), jnp.float32)
        for t in range(SEQ):
            g = xs[t:t + 1] @ w_ih.T + b_ih + h @ w_hh.T + b_hh
            i = jax.nn.sigmoid(g[:, 0 * HID:1 * HID])
            f = jax.nn.sigmoid(g[:, 1 * HID:2 * HID])
            gg = jnp.tanh(g[:, 2 * HID:3 * HID])
            o = jax.nn.sigmoid(g[:, 3 * HID:4 * HID])
            c = f * c + i * gg
            h = o * jnp.tanh(c)
        logits = h @ w_lin.T + b_lin
        return jax.nn.log_softmax(logits, axis=1)[0]

    y_ref = jnp.stack([ref_one(x[b]) for b in range(BATCH)])

    assert jnp.allclose(y_batched, y_ref, atol=1e-4, rtol=1e-4), "batched mismatch"
    assert jnp.allclose(y_single, y_ref[0], atol=1e-4, rtol=1e-4), "single mismatch"
    print("KERNEL_OK")
</pallas_src>

<mosaic_0001>
module attributes {stable_mosaic.version = 11 : i64} {
  func.func @_lstm_namer_kernel(%arg0: i32, %arg1: memref<1x64x27xf32, #tpu.memory_space<vmem>>, %arg2: memref<27x128xf32, #tpu.memory_space<vmem>>, %arg3: memref<32x128xf32, #tpu.memory_space<vmem>>, %arg4: memref<1x128xf32, #tpu.memory_space<vmem>>, %arg5: memref<32x27xf32, #tpu.memory_space<vmem>>, %arg6: memref<1x27xf32, #tpu.memory_space<vmem>>, %arg7: memref<8x27xf32, #tpu.memory_space<vmem>>) attributes {dimension_semantics = [#tpu.dimension_semantics<parallel>], iteration_bounds = array<i64: 2>, scalar_prefetch = 0 : i64, scratch_operands = 0 : i64, tpu.core_type = #tpu.core_type<tc>, window_params = [{transform_indices = @transform_0, window_bounds = array<i64: 1, 64, 27>}, {pipeline_mode = #tpu.pipeline_mode<synchronous>, transform_indices = @transform_1, window_bounds = array<i64: 27, 128>}, {pipeline_mode = #tpu.pipeline_mode<synchronous>, transform_indices = @transform_2, window_bounds = array<i64: 32, 128>}, {pipeline_mode = #tpu.pipeline_mode<synchronous>, transform_indices = @transform_3, window_bounds = array<i64: 1, 128>}, {pipeline_mode = #tpu.pipeline_mode<synchronous>, transform_indices = @transform_4, window_bounds = array<i64: 32, 27>}, {pipeline_mode = #tpu.pipeline_mode<synchronous>, transform_indices = @transform_5, window_bounds = array<i64: 1, 27>}, {transform_indices = @transform_6, window_bounds = array<i64: 8, 27>}]} {
    %c0 = arith.constant 0 : index
    %c0_0 = arith.constant 0 : index
    %c0_1 = arith.constant 0 : index
    %0 = vector.load %arg1[%c0, %c0_0, %c0_1] : memref<1x64x27xf32, #tpu.memory_space<vmem>>, vector<1x64x27xf32>
    %1 = vector.shape_cast %0 : vector<1x64x27xf32> to vector<64x27xf32>
    %c0_2 = arith.constant 0 : index
    %c0_3 = arith.constant 0 : index
    %2 = vector.load %arg2[%c0_2, %c0_3] : memref<27x128xf32, #tpu.memory_space<vmem>>, vector<27x128xf32>
    %cst = arith.constant dense<0.000000e+00> : vector<64x128xf32>
    %3 = tpu.matmul %1, %2, %cst {dimension_numbers = #tpu.dot_dimension_numbers<[1], [0], [0], [1], [0, 0, 1, 1], [], []>} : vector<64x27xf32>, vector<27x128xf32>, vector<64x128xf32> -> vector<64x128xf32>
    %c0_4 = arith.constant 0 : index
    %c0_5 = arith.constant 0 : index
    %4 = vector.load %arg4[%c0_4, %c0_5] : memref<1x128xf32, #tpu.memory_space<vmem>>, vector<1x128xf32>
    %5 = vector.broadcast %4 : vector<1x128xf32> to vector<64x128xf32>
    %6 = arith.addf %3, %5 : vector<64x128xf32>
    %c0_6 = arith.constant 0 : index
    %c0_7 = arith.constant 0 : index
    %7 = vector.load %arg3[%c0_6, %c0_7] : memref<32x128xf32, #tpu.memory_space<vmem>>, vector<32x128xf32>
    %8 = tpu.iota {dimensions = array<i32: 1>} : vector<1x128xi32>
    %c64_i32 = arith.constant 64 : i32
    %9 = vector.broadcast %c64_i32 : i32 to vector<1x128xi32>
    %10 = arith.cmpi sge, %8, %9 : vector<1x128xi32>
    %c96_i32 = arith.constant 96 : i32
    %11 = vector.broadcast %c96_i32 : i32 to vector<1x128xi32>
    %12 = arith.cmpi slt, %8, %11 : vector<1x128xi32>
    %13 = arith.andi %10, %12 : vector<1x128xi1>
    %cst_8 = arith.constant 0.000000e+00 : f32
    %14 = vector.broadcast %cst_8 : f32 to vector<8x32xf32>
    %cst_9 = arith.constant 0.000000e+00 : f32
    %15 = vector.broadcast %cst_9 : f32 to vector<8x32xf32>
    %16 = vector.extract_strided_slice %6 {offsets = [0, 0], sizes = [8, 128], strides = [1, 1]} : vector<64x128xf32> to vector<8x128xf32>
    %cst_10 = arith.constant dense<0.000000e+00> : vector<8x128xf32>
    %17 = tpu.matmul %14, %7, %cst_10 {dimension_numbers = #tpu.dot_dimension_numbers<[1], [0], [0], [1], [0, 0, 1, 1], [], []>} : vector<8x32xf32>, vector<32x128xf32>, vector<8x128xf32> -> vector<8x128xf32>
    %18 = arith.addf %16, %17 : vector<8x128xf32>
    %cst_11 = arith.constant 2.000000e+00 : f32
    %19 = vector.broadcast %cst_11 : f32 to vector<8x128xf32>
    %20 = arith.mulf %19, %18 : vector<8x128xf32>
    %21 = vector.shape_cast %13 : vector<1x128xi1> to vector<1x128xi1>
    %22 = vector.broadcast %21 : vector<1x128xi1> to vector<8x128xi1>
    %23 = arith.select %22, %20, %18 : vector<8x128xi1>, vector<8x128xf32>
    %24 = arith.negf %23 : vector<8x128xf32>
    %25 = math.exp %24 : vector<8x128xf32>
    %cst_12 = arith.constant 1.000000e+00 : f32
    %26 = vector.broadcast %cst_12 : f32 to vector<8x128xf32>
    %27 = arith.addf %26, %25 : vector<8x128xf32>
    %28 = arith.divf %26, %27 : vector<8x128xf32>
    %cst_13 = arith.constant 2.000000e+00 : f32
    %29 = vector.broadcast %cst_13 : f32 to vector<8x128xf32>
    %30 = arith.mulf %29, %28 : vector<8x128xf32>
    %cst_14 = arith.constant 1.000000e+00 : f32
    %31 = vector.broadcast %cst_14 : f32 to vector<8x128xf32>
    %32 = arith.subf %30, %31 : vector<8x128xf32>
    %33 = vector.shape_cast %13 : vector<1x128xi1> to vector<1x128xi1>
    %34 = vector.broadcast %33 : vector<1x128xi1> to vector<8x128xi1>
    %35 = arith.select %34, %32, %28 : vector<8x128xi1>, vector<8x128xf32>
    %36 = vector.extract_strided_slice %35 {offsets = [0, 0], sizes = [8, 32], strides = [1, 1]} : vector<8x128xf32> to vector<8x32xf32>
    %37 = vector.extract_strided_slice %35 {offsets = [0, 32], sizes = [8, 32], strides = [1, 1]} : vector<8x128xf32> to vector<8x32xf32>
    %38 = vector.extract_strided_slice %35 {offsets = [0, 64], sizes = [8, 32], strides = [1, 1]} : vector<8x128xf32> to vector<8x32xf32>
    %39 = vector.extract_strided_slice %35 {offsets = [0, 96], sizes = [8, 32], strides = [1, 1]} : vector<8x128xf32> to vector<8x32xf32>
    %40 = arith.mulf %37, %15 : vector<8x32xf32>
    %41 = arith.mulf %36, %38 : vector<8x32xf32>
    %42 = arith.addf %40, %41 : vector<8x32xf32>
    %43 = math.tanh %42 : vector<8x32xf32>
    %44 = arith.mulf %39, %43 : vector<8x32xf32>
    %45 = vector.extract_strided_slice %6 {offsets = [8, 0], sizes = [8, 128], strides = [1, 1]} : vector<64x128xf32> to vector<8x128xf32>
    %cst_15 = arith.constant dense<0.000000e+00> : vector<8x128xf32>
    %46 = tpu.matmul %44, %7, %cst_15 {dimension_numbers = #tpu.dot_dimension_numbers<[1], [0], [0], [1], [0, 0, 1, 1], [], []>} : vector<8x32xf32>, vector<32x128xf32>, vector<8x128xf32> -> vector<8x128xf32>
    %47 = arith.addf %45, %46 : vector<8x128xf32>
    %cst_16 = arith.constant 2.000000e+00 : f32
    %48 = vector.broadcast %cst_16 : f32 to vector<8x128xf32>
    %49 = arith.mulf %48, %47 : vector<8x128xf32>
    %50 = vector.shape_cast %13 : vector<1x128xi1> to vector<1x128xi1>
    %51 = vector.broadcast %50 : vector<1x128xi1> to vector<8x128xi1>
    %52 = arith.select %51, %49, %47 : vector<8x128xi1>, vector<8x128xf32>
    %53 = arith.negf %52 : vector<8x128xf32>
    %54 = math.exp %53 : vector<8x128xf32>
    %cst_17 = arith.constant 1.000000e+00 : f32
    %55 = vector.broadcast %cst_17 : f32 to vector<8x128xf32>
    %56 = arith.addf %55, %54 : vector<8x128xf32>
    %57 = arith.divf %55, %56 : vector<8x128xf32>
    %cst_18 = arith.constant 2.000000e+00 : f32
    %58 = vector.broadcast %cst_18 : f32 to vector<8x128xf32>
    %59 = arith.mulf %58, %57 : vector<8x128xf32>
    %cst_19 = arith.constant 1.000000e+00 : f32
    %60 = vector.broadcast %cst_19 : f32 to vector<8x128xf32>
    %61 = arith.subf %59, %60 : vector<8x128xf32>
    %62 = vector.shape_cast %13 : vector<1x128xi1> to vector<1x128xi1>
    %63 = vector.broadcast %62 : vector<1x128xi1> to vector<8x128xi1>
    %64 = arith.select %63, %61, %57 : vector<8x128xi1>, vector<8x128xf32>
    %65 = vector.extract_strided_slice %64 {offsets = [0, 0], sizes = [8, 32], strides = [1, 1]} : vector<8x128xf32> to vector<8x32xf32>
    %66 = vector.extract_strided_slice %64 {offsets = [0, 32], sizes = [8, 32], strides = [1, 1]} : vector<8x128xf32> to vector<8x32xf32>
    %67 = vector.extract_strided_slice %64 {offsets = [0, 64], sizes = [8, 32], strides = [1, 1]} : vector<8x128xf32> to vector<8x32xf32>
    %68 = vector.extract_strided_slice %64 {offsets = [0, 96], sizes = [8, 32], strides = [1, 1]} : vector<8x128xf32> to vector<8x32xf32>
    %69 = arith.mulf %66, %42 : vector<8x32xf32>
    %70 = arith.mulf %65, %67 : vector<8x32xf32>
    %71 = arith.addf %69, %70 : vector<8x32xf32>
    %72 = math.tanh %71 : vector<8x32xf32>
    %73 = arith.mulf %68, %72 : vector<8x32xf32>
    %74 = vector.extract_strided_slice %6 {offsets = [16, 0], sizes = [8, 128], strides = [1, 1]} : vector<64x128xf32> to vector<8x128xf32>
    %cst_20 = arith.constant dense<0.000000e+00> : vector<8x128xf32>
    %75 = tpu.matmul %73, %7, %cst_20 {dimension_numbers = #tpu.dot_dimension_numbers<[1], [0], [0], [1], [0, 0, 1, 1], [], []>} : vector<8x32xf32>, vector<32x128xf32>, vector<8x128xf32> -> vector<8x128xf32>
    %76 = arith.addf %74, %75 : vector<8x128xf32>
    %cst_21 = arith.constant 2.000000e+00 : f32
    %77 = vector.broadcast %cst_21 : f32 to vector<8x128xf32>
    %78 = arith.mulf %77, %76 : vector<8x128xf32>
    %79 = vector.shape_cast %13 : vector<1x128xi1> to vector<1x128xi1>
    %80 = vector.broadcast %79 : vector<1x128xi1> to vector<8x128xi1>
    %81 = arith.select %80, %78, %76 : vector<8x128xi1>, vector<8x128xf32>
    %82 = arith.negf %81 : vector<8x128xf32>
    %83 = math.exp %82 : vector<8x128xf32>
    %cst_22 = arith.constant 1.000000e+00 : f32
    %84 = vector.broadcast %cst_22 : f32 to vector<8x128xf32>
    %85 = arith.addf %84, %83 : vector<8x128xf32>
    %86 = arith.divf %84, %85 : vector<8x128xf32>
    %cst_23 = arith.constant 2.000000e+00 : f32
    %87 = vector.broadcast %cst_23 : f32 to vector<8x128xf32>
    %88 = arith.mulf %87, %86 : vector<8x128xf32>
    %cst_24 = arith.constant 1.000000e+00 : f32
    %89 = vector.broadcast %cst_24 : f32 to vector<8x128xf32>
    %90 = arith.subf %88, %89 : vector<8x128xf32>
    %91 = vector.shape_cast %13 : vector<1x128xi1> to vector<1x128xi1>
    %92 = vector.broadcast %91 : vector<1x128xi1> to vector<8x128xi1>
    %93 = arith.select %92, %90, %86 : vector<8x128xi1>, vector<8x128xf32>
    %94 = vector.extract_strided_slice %93 {offsets = [0, 0], sizes = [8, 32], strides = [1, 1]} : vector<8x128xf32> to vector<8x32xf32>
    %95 = vector.extract_strided_slice %93 {offsets = [0, 32], sizes = [8, 32], strides = [1, 1]} : vector<8x128xf32> to vector<8x32xf32>
    %96 = vector.extract_strided_slice %93 {offsets = [0, 64], sizes = [8, 32], strides = [1, 1]} : vector<8x128xf32> to vector<8x32xf32>
    %97 = vector.extract_strided_slice %93 {offsets = [0, 96], sizes = [8, 32], strides = [1, 1]} : vector<8x128xf32> to vector<8x32xf32>
    %98 = arith.mulf %95, %71 : vector<8x32xf32>
    %99 = arith.mulf %94, %96 : vector<8x32xf32>
    %100 = arith.addf %98, %99 : vector<8x32xf32>
    %101 = math.tanh %100 : vector<8x32xf32>
    %102 = arith.mulf %97, %101 : vector<8x32xf32>
    %103 = vector.extract_strided_slice %6 {offsets = [24, 0], sizes = [8, 128], strides = [1, 1]} : vector<64x128xf32> to vector<8x128xf32>
    %cst_25 = arith.constant dense<0.000000e+00> : vector<8x128xf32>
    %104 = tpu.matmul %102, %7, %cst_25 {dimension_numbers = #tpu.dot_dimension_numbers<[1], [0], [0], [1], [0, 0, 1, 1], [], []>} : vector<8x32xf32>, vector<32x128xf32>, vector<8x128xf32> -> vector<8x128xf32>
    %105 = arith.addf %103, %104 : vector<8x128xf32>
    %cst_26 = arith.constant 2.000000e+00 : f32
    %106 = vector.broadcast %cst_26 : f32 to vector<8x128xf32>
    %107 = arith.mulf %106, %105 : vector<8x128xf32>
    %108 = vector.shape_cast %13 : vector<1x128xi1> to vector<1x128xi1>
    %109 = vector.broadcast %108 : vector<1x128xi1> to vector<8x128xi1>
    %110 = arith.select %109, %107, %105 : vector<8x128xi1>, vector<8x128xf32>
    %111 = arith.negf %110 : vector<8x128xf32>
    %112 = math.exp %111 : vector<8x128xf32>
    %cst_27 = arith.constant 1.000000e+00 : f32
    %113 = vector.broadcast %cst_27 : f32 to vector<8x128xf32>
    %114 = arith.addf %113, %112 : vector<8x128xf32>
    %115 = arith.divf %113, %114 : vector<8x128xf32>
    %cst_28 = arith.constant 2.000000e+00 : f32
    %116 = vector.broadcast %cst_28 : f32 to vector<8x128xf32>
    %117 = arith.mulf %116, %115 : vector<8x128xf32>
    %cst_29 = arith.constant 1.000000e+00 : f32
    %118 = vector.broadcast %cst_29 : f32 to vector<8x128xf32>
    %119 = arith.subf %117, %118 : vector<8x128xf32>
    %120 = vector.shape_cast %13 : vector<1x128xi1> to vector<1x128xi1>
    %121 = vector.broadcast %120 : vector<1x128xi1> to vector<8x128xi1>
    %122 = arith.select %121, %119, %115 : vector<8x128xi1>, vector<8x128xf32>
    %123 = vector.extract_strided_slice %122 {offsets = [0, 0], sizes = [8, 32], strides = [1, 1]} : vector<8x128xf32> to vector<8x32xf32>
    %124 = vector.extract_strided_slice %122 {offsets = [0, 32], sizes = [8, 32], strides = [1, 1]} : vector<8x128xf32> to vector<8x32xf32>
    %125 = vector.extract_strided_slice %122 {offsets = [0, 64], sizes = [8, 32], strides = [1, 1]} : vector<8x128xf32> to vector<8x32xf32>
    %126 = vector.extract_strided_slice %122 {offsets = [0, 96], sizes = [8, 32], strides = [1, 1]} : vector<8x128xf32> to vector<8x32xf32>
    %127 = arith.mulf %124, %100 : vector<8x32xf32>
    %128 = arith.mulf %123, %125 : vector<8x32xf32>
    %129 = arith.addf %127, %128 : vector<8x32xf32>
    %130 = math.tanh %129 : vector<8x32xf32>
    %131 = arith.mulf %126, %130 : vector<8x32xf32>
    %132 = vector.extract_strided_slice %6 {offsets = [32, 0], sizes = [8, 128], strides = [1, 1]} : vector<64x128xf32> to vector<8x128xf32>
    %cst_30 = arith.constant dense<0.000000e+00> : vector<8x128xf32>
    %133 = tpu.matmul %131, %7, %cst_30 {dimension_numbers = #tpu.dot_dimension_numbers<[1], [0], [0], [1], [0, 0, 1, 1], [], []>} : vector<8x32xf32>, vector<32x128xf32>, vector<8x128xf32> -> vector<8x128xf32>
    %134 = arith.addf %132, %133 : vector<8x128xf32>
    %cst_31 = arith.constant 2.000000e+00 : f32
    %135 = vector.broadcast %cst_31 : f32 to vector<8x128xf32>
    %136 = arith.mulf %135, %134 : vector<8x128xf32>
    %137 = vector.shape_cast %13 : vector<1x128xi1> to vector<1x128xi1>
    %138 = vector.broadcast %137 : vector<1x128xi1> to vector<8x128xi1>
    %139 = arith.select %138, %136, %134 : vector<8x128xi1>, vector<8x128xf32>
    %140 = arith.negf %139 : vector<8x128xf32>
    %141 = math.exp %140 : vector<8x128xf32>
    %cst_32 = arith.constant 1.000000e+00 : f32
    %142 = vector.broadcast %cst_32 : f32 to vector<8x128xf32>
    %143 = arith.addf %142, %141 : vector<8x128xf32>
    %144 = arith.divf %142, %143 : vector<8x128xf32>
    %cst_33 = arith.constant 2.000000e+00 : f32
    %145 = vector.broadcast %cst_33 : f32 to vector<8x128xf32>
    %146 = arith.mulf %145, %144 : vector<8x128xf32>
    %cst_34 = arith.constant 1.000000e+00 : f32
    %147 = vector.broadcast %cst_34 : f32 to vector<8x128xf32>
    %148 = arith.subf %146, %147 : vector<8x128xf32>
    %149 = vector.shape_cast %13 : vector<1x128xi1> to vector<1x128xi1>
    %150 = vector.broadcast %149 : vector<1x128xi1> to vector<8x128xi1>
    %151 = arith.select %150, %148, %144 : vector<8x128xi1>, vector<8x128xf32>
    %152 = vector.extract_strided_slice %151 {offsets = [0, 0], sizes = [8, 32], strides = [1, 1]} : vector<8x128xf32> to vector<8x32xf32>
    %153 = vector.extract_strided_slice %151 {offsets = [0, 32], sizes = [8, 32], strides = [1, 1]} : vector<8x128xf32> to vector<8x32xf32>
    %154 = vector.extract_strided_slice %151 {offsets = [0, 64], sizes = [8, 32], strides = [1, 1]} : vector<8x128xf32> to vector<8x32xf32>
    %155 = vector.extract_strided_slice %151 {offsets = [0, 96], sizes = [8, 32], strides = [1, 1]} : vector<8x128xf32> to vector<8x32xf32>
    %156 = arith.mulf %153, %129 : vector<8x32xf32>
    %157 = arith.mulf %152, %154 : vector<8x32xf32>
    %158 = arith.addf %156, %157 : vector<8x32xf32>
    %159 = math.tanh %158 : vector<8x32xf32>
    %160 = arith.mulf %155, %159 : vector<8x32xf32>
    %161 = vector.extract_strided_slice %6 {offsets = [40, 0], sizes = [8, 128], strides = [1, 1]} : vector<64x128xf32> to vector<8x128xf32>
    %cst_35 = arith.constant dense<0.000000e+00> : vector<8x128xf32>
    %162 = tpu.matmul %160, %7, %cst_35 {dimension_numbers = #tpu.dot_dimension_numbers<[1], [0], [0], [1], [0, 0, 1, 1], [], []>} : vector<8x32xf32>, vector<32x128xf32>, vector<8x128xf32> -> vector<8x128xf32>
    %163 = arith.addf %161, %162 : vector<8x128xf32>
    %cst_36 = arith.constant 2.000000e+00 : f32
    %164 = vector.broadcast %cst_36 : f32 to vector<8x128xf32>
    %165 = arith.mulf %164, %163 : vector<8x128xf32>
    %166 = vector.shape_cast %13 : vector<1x128xi1> to vector<1x128xi1>
    %167 = vector.broadcast %166 : vector<1x128xi1> to vector<8x128xi1>
    %168 = arith.select %167, %165, %163 : vector<8x128xi1>, vector<8x128xf32>
    %169 = arith.negf %168 : vector<8x128xf32>
    %170 = math.exp %169 : vector<8x128xf32>
    %cst_37 = arith.constant 1.000000e+00 : f32
    %171 = vector.broadcast %cst_37 : f32 to vector<8x128xf32>
    %172 = arith.addf %171, %170 : vector<8x128xf32>
    %173 = arith.divf %171, %172 : vector<8x128xf32>
    %cst_38 = arith.constant 2.000000e+00 : f32
    %174 = vector.broadcast %cst_38 : f32 to vector<8x128xf32>
    %175 = arith.mulf %174, %173 : vector<8x128xf32>
    %cst_39 = arith.constant 1.000000e+00 : f32
    %176 = vector.broadcast %cst_39 : f32 to vector<8x128xf32>
    %177 = arith.subf %175, %176 : vector<8x128xf32>
    %178 = vector.shape_cast %13 : vector<1x128xi1> to vector<1x128xi1>
    %179 = vector.broadcast %178 : vector<1x128xi1> to vector<8x128xi1>
    %180 = arith.select %179, %177, %173 : vector<8x128xi1>, vector<8x128xf32>
    %181 = vector.extract_strided_slice %180 {offsets = [0, 0], sizes = [8, 32], strides = [1, 1]} : vector<8x128xf32> to vector<8x32xf32>
    %182 = vector.extract_strided_slice %180 {offsets = [0, 32], sizes = [8, 32], strides = [1, 1]} : vector<8x128xf32> to vector<8x32xf32>
    %183 = vector.extract_strided_slice %180 {offsets = [0, 64], sizes = [8, 32], strides = [1, 1]} : vector<8x128xf32> to vector<8x32xf32>
    %184 = vector.extract_strided_slice %180 {offsets = [0, 96], sizes = [8, 32], strides = [1, 1]} : vector<8x128xf32> to vector<8x32xf32>
    %185 = arith.mulf %182, %158 : vector<8x32xf32>
    %186 = arith.mulf %181, %183 : vector<8x32xf32>
    %187 = arith.addf %185, %186 : vector<8x32xf32>
    %188 = math.tanh %187 : vector<8x32xf32>
    %189 = arith.mulf %184, %188 : vector<8x32xf32>
    %190 = vector.extract_strided_slice %6 {offsets = [48, 0], sizes = [8, 128], strides = [1, 1]} : vector<64x128xf32> to vector<8x128xf32>
    %cst_40 = arith.constant dense<0.000000e+00> : vector<8x128xf32>
    %191 = tpu.matmul %189, %7, %cst_40 {dimension_numbers = #tpu.dot_dimension_numbers<[1], [0], [0], [1], [0, 0, 1, 1], [], []>} : vector<8x32xf32>, vector<32x128xf32>, vector<8x128xf32> -> vector<8x128xf32>
    %192 = arith.addf %190, %191 : vector<8x128xf32>
    %cst_41 = arith.constant 2.000000e+00 : f32
    %193 = vector.broadcast %cst_41 : f32 to vector<8x128xf32>
    %194 = arith.mulf %193, %192 : vector<8x128xf32>
    %195 = vector.shape_cast %13 : vector<1x128xi1> to vector<1x128xi1>
    %196 = vector.broadcast %195 : vector<1x128xi1> to vector<8x128xi1>
    %197 = arith.select %196, %194, %192 : vector<8x128xi1>, vector<8x128xf32>
    %198 = arith.negf %197 : vector<8x128xf32>
    %199 = math.exp %198 : vector<8x128xf32>
    %cst_42 = arith.constant 1.000000e+00 : f32
    %200 = vector.broadcast %cst_42 : f32 to vector<8x128xf32>
    %201 = arith.addf %200, %199 : vector<8x128xf32>
    %202 = arith.divf %200, %201 : vector<8x128xf32>
    %cst_43 = arith.constant 2.000000e+00 : f32
    %203 = vector.broadcast %cst_43 : f32 to vector<8x128xf32>
    %204 = arith.mulf %203, %202 : vector<8x128xf32>
    %cst_44 = arith.constant 1.000000e+00 : f32
    %205 = vector.broadcast %cst_44 : f32 to vector<8x128xf32>
    %206 = arith.subf %204, %205 : vector<8x128xf32>
    %207 = vector.shape_cast %13 : vector<1x128xi1> to vector<1x128xi1>
    %208 = vector.broadcast %207 : vector<1x128xi1> to vector<8x128xi1>
    %209 = arith.select %208, %206, %202 : vector<8x128xi1>, vector<8x128xf32>
    %210 = vector.extract_strided_slice %209 {offsets = [0, 0], sizes = [8, 32], strides = [1, 1]} : vector<8x128xf32> to vector<8x32xf32>
    %211 = vector.extract_strided_slice %209 {offsets = [0, 32], sizes = [8, 32], strides = [1, 1]} : vector<8x128xf32> to vector<8x32xf32>
    %212 = vector.extract_strided_slice %209 {offsets = [0, 64], sizes = [8, 32], strides = [1, 1]} : vector<8x128xf32> to vector<8x32xf32>
    %213 = vector.extract_strided_slice %209 {offsets = [0, 96], sizes = [8, 32], strides = [1, 1]} : vector<8x128xf32> to vector<8x32xf32>
    %214 = arith.mulf %211, %187 : vector<8x32xf32>
    %215 = arith.mulf %210, %212 : vector<8x32xf32>
    %216 = arith.addf %214, %215 : vector<8x32xf32>
    %217 = math.tanh %216 : vector<8x32xf32>
    %218 = arith.mulf %213, %217 : vector<8x32xf32>
    %219 = vector.extract_strided_slice %6 {offsets = [56, 0], sizes = [8, 128], strides = [1, 1]} : vector<64x128xf32> to vector<8x128xf32>
    %cst_45 = arith.constant dense<0.000000e+00> : vector<8x128xf32>
    %220 = tpu.matmul %218, %7, %cst_45 {dimension_numbers = #tpu.dot_dimension_numbers<[1], [0], [0], [1], [0, 0, 1, 1], [], []>} : vector<8x32xf32>, vector<32x128xf32>, vector<8x128xf32> -> vector<8x128xf32>
    %221 = arith.addf %219, %220 : vector<8x128xf32>
    %cst_46 = arith.constant 2.000000e+00 : f32
    %222 = vector.broadcast %cst_46 : f32 to vector<8x128xf32>
    %223 = arith.mulf %222, %221 : vector<8x128xf32>
    %224 = vector.shape_cast %13 : vector<1x128xi1> to vector<1x128xi1>
    %225 = vector.broadcast %224 : vector<1x128xi1> to vector<8x128xi1>
    %226 = arith.select %225, %223, %221 : vector<8x128xi1>, vector<8x128xf32>
    %227 = arith.negf %226 : vector<8x128xf32>
    %228 = math.exp %227 : vector<8x128xf32>
    %cst_47 = arith.constant 1.000000e+00 : f32
    %229 = vector.broadcast %cst_47 : f32 to vector<8x128xf32>
    %230 = arith.addf %229, %228 : vector<8x128xf32>
    %231 = arith.divf %229, %230 : vector<8x128xf32>
    %cst_48 = arith.constant 2.000000e+00 : f32
    %232 = vector.broadcast %cst_48 : f32 to vector<8x128xf32>
    %233 = arith.mulf %232, %231 : vector<8x128xf32>
    %cst_49 = arith.constant 1.000000e+00 : f32
    %234 = vector.broadcast %cst_49 : f32 to vector<8x128xf32>
    %235 = arith.subf %233, %234 : vector<8x128xf32>
    %236 = vector.shape_cast %13 : vector<1x128xi1> to vector<1x128xi1>
    %237 = vector.broadcast %236 : vector<1x128xi1> to vector<8x128xi1>
    %238 = arith.select %237, %235, %231 : vector<8x128xi1>, vector<8x128xf32>
    %239 = vector.extract_strided_slice %238 {offsets = [0, 0], sizes = [8, 32], strides = [1, 1]} : vector<8x128xf32> to vector<8x32xf32>
    %240 = vector.extract_strided_slice %238 {offsets = [0, 32], sizes = [8, 32], strides = [1, 1]} : vector<8x128xf32> to vector<8x32xf32>
    %241 = vector.extract_strided_slice %238 {offsets = [0, 64], sizes = [8, 32], strides = [1, 1]} : vector<8x128xf32> to vector<8x32xf32>
    %242 = vector.extract_strided_slice %238 {offsets = [0, 96], sizes = [8, 32], strides = [1, 1]} : vector<8x128xf32> to vector<8x32xf32>
    %243 = arith.mulf %240, %216 : vector<8x32xf32>
    %244 = arith.mulf %239, %241 : vector<8x32xf32>
    %245 = arith.addf %243, %244 : vector<8x32xf32>
    %246 = math.tanh %245 : vector<8x32xf32>
    %247 = arith.mulf %242, %246 : vector<8x32xf32>
    %c0_50 = arith.constant 0 : index
    %c0_51 = arith.constant 0 : index
    %248 = vector.load %arg5[%c0_50, %c0_51] : memref<32x27xf32, #tpu.memory_space<vmem>>, vector<32x27xf32>
    %cst_52 = arith.constant dense<0.000000e+00> : vector<8x27xf32>
    %249 = tpu.matmul %247, %248, %cst_52 {dimension_numbers = #tpu.dot_dimension_numbers<[1], [0], [0], [1], [0, 0, 1, 1], [], []>} : vector<8x32xf32>, vector<32x27xf32>, vector<8x27xf32> -> vector<8x27xf32>
    %c0_53 = arith.constant 0 : index
    %c0_54 = arith.constant 0 : index
    %250 = vector.load %arg6[%c0_53, %c0_54] : memref<1x27xf32, #tpu.memory_space<vmem>>, vector<1x27xf32>
    %251 = vector.broadcast %250 : vector<1x27xf32> to vector<8x27xf32>
    %252 = arith.addf %249, %251 : vector<8x27xf32>
    %cst_55 = arith.constant dense<0xFF800000> : vector<8xf32>
    %253 = vector.multi_reduction <maximumf>, %252, %cst_55 [1] : vector<8x27xf32> to vector<8xf32>
    %254 = vector.shape_cast %253 : vector<8xf32> to vector<8x1xf32>
    %255 = vector.broadcast %254 : vector<8x1xf32> to vector<8x27xf32>
    %256 = arith.subf %252, %255 : vector<8x27xf32>
    %257 = math.exp %256 : vector<8x27xf32>
    %cst_56 = arith.constant dense<0.000000e+00> : vector<8xf32>
    %258 = vector.multi_reduction <add>, %257, %cst_56 [1] : vector<8x27xf32> to vector<8xf32>
    %259 = vector.shape_cast %258 : vector<8xf32> to vector<8x1xf32>
    %260 = math.log %259 : vector<8x1xf32>
    %261 = arith.addf %260, %254 : vector<8x1xf32>
    %262 = vector.broadcast %261 : vector<8x1xf32> to vector<8x27xf32>
    %263 = arith.subf %252, %262 : vector<8x27xf32>
    %c0_57 = arith.constant 0 : index
    %c0_58 = arith.constant 0 : index
    %264 = vector.load %arg7[%c0_57, %c0_58] : memref<8x27xf32, #tpu.memory_space<vmem>>, vector<8x27xf32>
    tpu.vector_store %arg7[%c0_57, %c0_58], %263 {strides = array<i32>} : memref<8x27xf32, #tpu.memory_space<vmem>>, vector<8x27xf32>,
    return
  }
  func.func @transform_0(%arg0: i32) -> (i32, i32, i32) {
    %c0_i32 = arith.constant 0 : i32
    %c0_i32_0 = arith.constant 0 : i32
    %c0_i32_1 = arith.constant 0 : i32
    return %arg0, %c0_i32, %c0_i32_0 : i32, i32, i32
  }
  func.func @transform_1(%arg0: i32) -> (i32, i32) {
    %c0_i32 = arith.constant 0 : i32
    %c0_i32_0 = arith.constant 0 : i32
    %c0_i32_1 = arith.constant 0 : i32
    return %c0_i32, %c0_i32_0 : i32, i32
  }
  func.func @transform_2(%arg0: i32) -> (i32, i32) {
    %c0_i32 = arith.constant 0 : i32
    %c0_i32_0 = arith.constant 0 : i32
    %c0_i32_1 = arith.constant 0 : i32
    return %c0_i32, %c0_i32_0 : i32, i32
  }
  func.func @transform_3(%arg0: i32) -> (i32, i32) {
    %c0_i32 = arith.constant 0 : i32
    %c0_i32_0 = arith.constant 0 : i32
    %c0_i32_1 = arith.constant 0 : i32
    return %c0_i32, %c0_i32_0 : i32, i32
  }
  func.func @transform_4(%arg0: i32) -> (i32, i32) {
    %c0_i32 = arith.constant 0 : i32
    %c0_i32_0 = arith.constant 0 : i32
    %c0_i32_1 = arith.constant 0 : i32
    return %c0_i32, %c0_i32_0 : i32, i32
  }
  func.func @transform_5(%arg0: i32) -> (i32, i32) {
    %c0_i32 = arith.constant 0 : i32
    %c0_i32_0 = arith.constant 0 : i32
    %c0_i32_1 = arith.constant 0 : i32
    return %c0_i32, %c0_i32_0 : i32, i32
  }
  func.func @transform_6(%arg0: i32) -> (i32, i32) {
    %c0_i32 = arith.constant 0 : i32
    %c0_i32_0 = arith.constant 0 : i32
    return %arg0, %c0_i32 : i32, i32
  }
}

</mosaic_0001>

<bundles_post_ra>
// kernel: lstm_namer_forward_batched.1
= control target key start
LH: loop header
LB: loop body
LE: loop exit
PB: predicated region body
PF: predicated region fallthrough
CT: control target
= control target key end

     0   :  { %11 = vsyncpa [#allocation3], 0  ;;  %s2181_s0 = inlined_call_operand.vmem [shape: f32[2,64,27], index: 0, kind: input, shape index: {}]   ;;  %s2182_s1 = inlined_call_operand.vmem [shape: f32[27,128], index: 1, kind: input, shape index: {}]   ;;  %s2183_s2 = inlined_call_operand.vmem [shape: f32[32,128], index: 2, kind: input, shape index: {}]   ;;  %s2184_s3 = inlined_call_operand.vmem [shape: f32[1,128], index: 3, kind: input, shape index: {}]   ;;  %s2185_s4 = inlined_call_operand.vmem [shape: f32[32,27], index: 4, kind: input, shape index: {}]   ;;  %s2186_s5 = inlined_call_operand.vmem [shape: f32[1,27], index: 5, kind: input, shape index: {}]   ;;  %s2187_s6 = inlined_call_operand.hbm [shape: f32[16,27], index: 6, kind: output, shape index: {}]  }
   0x1   :  { %13 = vsyncpa [#allocation3 + $0x1], 0  ;;  %s1838_s21 = smov 0   ;;  %s1840_s22 = smov 0  }
   0x2   :  { %s1842_s23 = smov 0   ;;  %s1844_s24 = smov 0  }
   0x3 LB: > { %s1859_s25 = sadd.s32 4294967295, %s1796_s24   ;;  %s1418_s26 = sadd.s32 4294967294, %s1796_s24   ;;  %s1796_s24 = sphi %s1844_s24, %s2195_s24   ;;  %s1792_s23 = sphi %s1842_s23, %s2194_s23   ;;  %s1788_s22 = sphi %s1840_s22, %s2193_s22   ;;  %s1784_s21 = sphi %s1838_s21, %s2192_s21  }
   0x4   : > { %s1863_s27 = sadd.s32 1, %s1796_s24   ;;  %s157_s28 = sadd.s32 1, %s1792_s23 }
   0x5   : > { %s154_s29 = ssub.s32 %s1796_s24, %s1863_s27  ;;  %p167_p0 = scmp.ne.s32.totalorder %s1792_s23, %s1788_s22 }
   0x6   : > { %p155_p1 = scmp.eq.s32.totalorder %s154_s29, 0  ;;  %p168_p2 = scmp.eq.s32.totalorder %s1859_s25, 1 }
   0x7   : > { %p173_p3 = scmp.ne.s32.totalorder %s1788_s22, %s1784_s21  ;;  %p174_p4 = scmp.eq.s32.totalorder %s1418_s26, 1 }
   0x8   : > { %s1874_s30 = scalar_select %p155_p1, %s1792_s23, %s157_s28  }
   0x9   : > { %p1876_p5 = por %p168_p2, %p167_p0  ;;  %p1880_p6 = por %p174_p4, %p173_p3 }
   0xa   : > { %p1421_p7 = scmp.ge.s32.totalorder %s1796_s24, 1  ;;  %p215_p8 = scmp.lt.s32.totalorder %s1796_s24, 3 }
   0xc   : > { %p216_p9 = pnand %p1421_p7, %p215_p8 }
   0xd   : > { %p245_p10 = scmp.lt.s32.totalorder (!%p216_p9), %s1859_s25, 1  ;;  %s1800_s17 = smov (!%p216_p9), 64  }
   0xe   : > { %219 = sbr.rel (%p216_p9) target bundleno = 6276 (0x1884), region = 44  ;;  %s1801_s18 = smov (!%p216_p9), 32  }
   0xf   : > { %s242_s14 = sand.u32 (!%p216_p9), 1, %s1788_s22   ;;  %s1461_s16 = sshll.u32 (!%p216_p9), %s1859_s25, 7 }
  0x10   : > { %s1422_s15 = sshll.u32 (!%p216_p9), %s242_s14, 3  ;;  %s1357_s26 = scalar_lea.hbm (!%p216_p9), %s2187_s6, %s1461_s16 }
  0x11   : > { %s1346_s28 = scalar_lea.sflag (!%p216_p9), [#allocation3], %s242_s14 }
  0x13   : > { %v261_v0 = vld [vmem:[%s2182_s1 + $0x18] sm:$0x7]  ;;  %vm294_vm0 = vcmask 1042432   ;;  %v260_v1 = vld [vmem:[%s2182_s1 + $0x10] sm:$0xff]  ;;  %v1798_v3 = vmov 0.0   ;;  %v259_v5 = vld [vmem:[%s2182_s1 + $0x8] sm:$0xff]  ;;  %v407_v11 = vlaneseq }
  0x14   : > { %v1895_v2 = vld [vmem:[%s2183_s2 + $0x18] sm:$0xff]  ;;  %1522 = vmatprep.subr.msk.mxu0 %vm294_vm0, %v261_v0  ;;  %1542 = vmatprep.subr.mxu1 %v1798_v3  ;;  %v1901_v4 = vld [vmem:[%s2183_s2 + $0x10] sm:$0xff]  ;;  %s246_s19 = scalar_select %p245_p10, %s1859_s25, 1  ;;  %v1913_v6 = vld [vmem:[%s2183_s2 + $0x8] sm:$0xff]  ;;  %vm269_vm1 = vcmask 220160   ;;  %vm1799_vm2 = vmmov 0  }
  0x15   : > { %1523 = vmatpush3.msk.msra.mxu0 %vm294_vm0, %v261_v0  ;;  %1543 = vmatpush3.msra.mxu1 %v1895_v2  ;;  %v258_v7 = vld [vmem:[%s2182_s1] sm:$0xff]  ;;  %v408_v12 = vand.u32 127, %v407_v11  ;;  %vm412_vm6 = vcmask 261120   ;;  %v1246_v20 = vld [vmem:[%s2185_s4 + $0x8] sm:$0xff] }
  0x16   : > { %1524 = vmatprep.subr.mxu0 %v260_v1  ;;  %1544 = vmatprep.subr.mxu1 %v1798_v3  ;;  %s1464_s9 = sshll.u32 %s246_s19, 6  ;;  %v1929_v8 = vld [vmem:[%s2183_s2] sm:$0xff] }
  0x17   : > { %1525 = vmatpush3.msra.mxu0 %v260_v1  ;;  %1545 = vmatpush3.msra.mxu1 %v1901_v4  ;;  %s1923_s12 = scalar_lea.vmem %s2181_s0, %s1464_s9  ;;  %v1963_v14 = vld [vmem:[%s2184_s3] ss:$0 sm:$0xff]  ;;  %vm409_vm3 = vcmp.ge.s32.totalorder %v408_v12, 64  ;;  %vm410_vm4 = vcmp.lt.s32.totalorder %v408_v12, 96  ;;  %s1802_s9 = smov [#allocation2]  }
  0x18   : > { %1526 = vmatprep.subr.mxu0 %v259_v5  ;;  %1546 = vmatprep.subr.mxu1 %v1798_v3  ;;  %v250_v9 = vld [vmem:[%s1923_s12] sm:$0xff]  ;;  %v251_v10 = vld [vmem:[%s1923_s12 + $0x8] sm:$0xff]  ;;  %vm1966_vm5 = vmand %vm409_vm3, %vm410_vm4  ;;  %s1740_s10 = sshll.u32 %s1802_s9, 4  ;;  %s1741_s10 = int_to_ptr.vmem [resolvable:$false] %s1740_s10 }
  0x19   : > { %1527 = vmatpush3.msra.mxu0 %v259_v5  ;;  %1547 = vmatpush3.msra.mxu1 %v1913_v6  ;;  %v252_v57 = vld [vmem:[%s1923_s12 + $0x10] sm:$0xff]  ;;  %v253_v58 = vld [vmem:[%s1923_s12 + $0x18] sm:$0xff]  ;;  %v254_v59 = vld [vmem:[%s1923_s12 + $0x20] sm:$0xff]  ;;  %s1742_s25 = scalar_lea.vmem %s1741_s10, 256 }
  0x1a   : > { %1528 = vmatprep.subr.mxu0 %v258_v7  ;;  %1548 = vmatprep.subr.mxu1 %v1798_v3  ;;  %v255_v60 = vld [vmem:[%s1923_s12 + $0x28] sm:$0xff]  ;;  %v256_v61 = vld [vmem:[%s1923_s12 + $0x30] sm:$0xff]  ;;  %v257_v62 = vld [vmem:[%s1923_s12 + $0x38] sm:$0xff] }
  0x1b   : > { %1529 = vmatpush3.msra.mxu0 %v258_v7  ;;  %1530 = vmatprep.mubr.msk.f32.mxu0 %vm269_vm1, %v250_v9 }
  0x1c   : > { %1531 = vmatmul.mubr.msk.f32.vlgmr.msra.gmra.mxu0 %vm269_vm1, %v251_v10  ;;  %1549 = vmatpush3.msra.mxu1 %v1929_v8 }
  0x1d   : > { %1550 = vmatprep.mubr.msk.f32.mxu1 %vm1799_vm2, %v1798_v3  ;;  %1553 = vmatprep.subr.mxu1 %v1798_v3 }
  0x1e   : > { %1551 = vmatmul.mubr.f32.vlgmr.msra.gmra.mxu1 %v1798_v3  ;;  %1564 = vmatprep.subr.mxu0 %v1798_v3 }
  0x1f   : > { %1554 = vmatpush3.msra.mxu1 %v1895_v2  ;;  %1561 = vmatprep.mubr.msk.f32.mxu1 %vm1799_vm2, %v1798_v3 }
  0x20   : > { %1555 = vmatprep.subr.mxu1 %v1798_v3  ;;  %1565 = vmatpush3.msra.mxu0 %v1895_v2 }
  0x21   : > { %1556 = vmatpush3.msra.mxu1 %v1901_v4  ;;  %1566 = vmatprep.subr.mxu0 %v1798_v3 }
  0x22   : > { %1557 = vmatprep.subr.mxu1 %v1798_v3  ;;  %1567 = vmatpush3.msra.mxu0 %v1901_v4 }
  0x23   : > { %1558 = vmatpush3.msra.mxu1 %v1913_v6  ;;  %1568 = vmatprep.subr.mxu0 %v1798_v3 }
  0x24   : > { %1559 = vmatprep.subr.mxu1 %v1798_v3  ;;  %1569 = vmatpush3.msra.mxu0 %v1913_v6 }
  0x25   : > { %1560 = vmatpush3.msra.mxu1 %v1929_v8  ;;  %1570 = vmatprep.subr.mxu0 %v1798_v3 }
  0x26   : > { %1571 = vmatpush3.msra.mxu0 %v1929_v8  ;;  %1575 = vmatprep.subr.mxu1 %v1798_v3 }
  0x27   : > { %1586 = vmatprep.subr.mxu0 %v1798_v3  ;;  %1533 = vmatprep.mubr.msk.f32.mxu0 %vm269_vm1, %v252_v57 }
  0x28   : > { %1534 = vmatmul.mubr.msk.f32.gmra.mxu0 %vm269_vm1, %v253_v58 }
  0x29   : > { %1536 = vmatprep.mubr.msk.f32.mxu0 %vm269_vm1, %v254_v59 }
  0x2c   : > { %1537 = vmatmul.mubr.msk.f32.gmra.mxu0 %vm269_vm1, %v255_v60 }
  0x2d   : > { %1539 = vmatprep.mubr.msk.f32.mxu0 %vm269_vm1, %v256_v61 }
  0x30   : > { %1540 = vmatmul.mubr.msk.f32.gmra.mxu0 %vm269_vm1, %v257_v62 }
  0x31   : > { %1572 = vmatprep.mubr.msk.f32.mxu0 %vm1799_vm2, %v1798_v3 }
  0xdc   : > { %v1532_v13 = vpop.f32.mrf.mxu0 }
  0xdd   : > { %v370_v39 = vadd.f32 %v1532_v13, %v1963_v14 }
  0xde   : > { %v364_v15 = vpop.f32.mrf.mxu0  ;;  %v482_v16 = vpop.f32.mrf.mxu1 }
  0xdf   : > { %v365_v17 = vadd.f32 %v1963_v14, %v364_v15 }
  0xe0   : > { %v1552_v18 = vpop.f32.mrf.mxu1 }
  0xe1   : > { %v486_v19 = vadd.f32 %v482_v16, %v365_v17 }
  0xe3   : > { %v487_v21 = vmul.f32 2.0, %v486_v19 }
  0xe5   : > { %v490_v22 = vsel %vm1966_vm5, %v487_v21, %v486_v19 }
  0xe6   : > { %v1435_v23 = vmul.f32 -1.442695, %v490_v22 }
  0xe8   : > { %1684 = vpow2.f32 %v1435_v23  ;;  %v1535_v7 = vpop.f32.mrf.mxu0 }
  0xea   : > { %v374_v9 = vpop.f32.mrf.mxu0 }
  0xeb   : > { %v375_v15 = vadd.f32 %v1963_v14, %v374_v9 }
  0xec   : > { %v2023_v10 = vpop.f32.mrf.mxu0 }
  0xee   : > { %v2025_v11 = vpop.f32.mrf.mxu0 }
  0xef   : > { %v385_v60 = vadd.f32 %v1963_v14, %v2025_v11 }
  0xf0   : > { %v2027_v12 = vpop.f32.mrf.mxu0 }
  0xf2   : > { %v2029_v13 = vpop.f32.mrf.mxu0 }
  0xf5   : > { %v1685_v24 = vpop.eup %1684 }
  0xf6   : > { %v494_v25 = vadd.f32 1.0, %v1685_v24 }
  0xf8   : > { %1686 = vrcp.f32 %v494_v25 }
 0x105   : > { %v1687_v26 = vpop.eup %1686 }
 0x106   : > { %v497_v27 = vmul.f32 2.0, %v1687_v26 }
 0x108   : > { %v1436_v28 = vadd.f32 -1.0, %v497_v27 }
 0x10a   : > { %v499_v29 = vsel %vm1966_vm5, %v1436_v28, %v1687_v26 }
 0x10b   : > { %502 = vrot.lane.b32.xlu0 %v499_v29, %s1800_s17  ;;  %v500_v32 = vmul.f32 0.0, %v499_v29 }
 0x17d   : > { %v503_v30 = vpop.permute.xlu0 %502 }
 0x17e   : > { %v505_v31 = vmul.f32 %v503_v30, %v499_v29 }
 0x180   : > { %507 = vrot.lane.b32.xlu0 %v505_v31, %s1801_s18 }
 0x1f2   : > { %v508_v33 = vpop.permute.xlu0 %507 }
 0x1f3   : > { %v510_v34 = vadd.f32 %v508_v33, %v500_v32 }
 0x1f5   : > { %1688 = vtanh.f32 %v510_v34 }
 0x202   : > { %v1689_v35 = vpop.eup %1688 }
 0x203   : > { %513 = vrot.lane.b32.xlu1 %v1689_v35, %s1800_s17 }
 0x275   : > { %v514_v36 = vpop.permute.xlu1 %513 }
 0x276   : > { %v516_v37 = vmul.f32 %v514_v36, %v499_v29 }
 0x278   : > { %518 = vrot.lane.b32.xlu1 %v516_v37, %s1801_s18 }
 0x2ea   : > { %v519_v38 = vpop.permute.xlu1 %518 }
 0x2eb   : > { %1562 = vmatmul.mubr.msk.f32.vlgmr.msra.gmra.mxu1 %vm412_vm6, %v519_v38  ;;  %v380_v38 = vadd.f32 %v1535_v7, %v1963_v14 }
 0x2ec   : > { %1576 = vmatpush3.msra.mxu1 %v1895_v2  ;;  %1583 = vmatprep.mubr.msk.f32.mxu1 %vm1799_vm2, %v1798_v3 }
 0x2ed   : > { %1577 = vmatprep.subr.mxu1 %v1798_v3 }
 0x2ee   : > { %1578 = vmatpush3.msra.mxu1 %v1901_v4 }
 0x2ef   : > { %1579 = vmatprep.subr.mxu1 %v1798_v3 }
 0x2f0   : > { %1580 = vmatpush3.msra.mxu1 %v1913_v6 }
 0x2f1   : > { %1581 = vmatprep.subr.mxu1 %v1798_v3 }
 0x2f2   : > { %1582 = vmatpush3.msra.mxu1 %v1929_v8 }
 0x2f3   : > { %1597 = vmatprep.subr.mxu1 %v1798_v3 }
 0x3ab   : > { %v588_v40 = vpop.f32.mrf.mxu1 }
 0x3ac   : > { %v592_v41 = vadd.f32 %v588_v40, %v370_v39 }
 0x3ad   : > { %v1563_v42 = vpop.f32.mrf.mxu1 }
 0x3ae   : > { %v593_v43 = vmul.f32 2.0, %v592_v41 }
 0x3b0   : > { %v594_v44 = vsel %vm1966_vm5, %v593_v43, %v592_v41 }
 0x3b1   : > { %v1438_v45 = vmul.f32 -1.442695, %v594_v44 }
 0x3b3   : > { %1690 = vpow2.f32 %v1438_v45 }
 0x3c0   : > { %v1691_v46 = vpop.eup %1690 }
 0x3c1   : > { %v598_v47 = vadd.f32 1.0, %v1691_v46 }
 0x3c3   : > { %1692 = vrcp.f32 %v598_v47 }
 0x3d0   : > { %v1693_v48 = vpop.eup %1692 }
 0x3d1   : > { %v601_v49 = vmul.f32 2.0, %v1693_v48 }
 0x3d3   : > { %v1439_v50 = vadd.f32 -1.0, %v601_v49 }
 0x3d5   : > { %v603_v51 = vsel %vm1966_vm5, %v1439_v50, %v1693_v48 }
 0x3d6   : > { %606 = vrot.lane.b32.xlu0 %v603_v51, %s1800_s17  ;;  %v604_v54 = vmul.f32 %v603_v51, %v510_v34 }
 0x448   : > { %v607_v52 = vpop.permute.xlu0 %606 }
 0x449   : > { %v609_v53 = vmul.f32 %v607_v52, %v603_v51 }
 0x44b   : > { %611 = vrot.lane.b32.xlu1 %v609_v53, %s1801_s18 }
 0x4bd   : > { %v612_v55 = vpop.permute.xlu1 %611 }
 0x4be   : > { %v614_v56 = vadd.f32 %v612_v55, %v604_v54 }
 0x4c0   : > { %1694 = vtanh.f32 %v614_v56 }
 0x4cd   : > { %v1695_v63 = vpop.eup %1694 }
 0x4ce   : > { %617 = vrot.lane.b32.xlu0 %v1695_v63, %s1800_s17 }
 0x540   : > { %v618_v0 = vpop.permute.xlu0 %617 }
 0x541   : > { %v620_v1 = vmul.f32 %v618_v0, %v603_v51 }
 0x543   : > { %622 = vrot.lane.b32.xlu1 %v620_v1, %s1801_s18 }
 0x5b5   : > { %v623_v5 = vpop.permute.xlu1 %622 }
 0x5b6   : > { %1573 = vmatmul.mubr.msk.f32.vlgmr.msra.gmra.mxu0 %vm412_vm6, %v623_v5 }
 0x5b7   : > { %1587 = vmatpush3.msra.mxu0 %v1895_v2  ;;  %1594 = vmatprep.mubr.msk.f32.mxu0 %vm1799_vm2, %v1798_v3 }
 0x5b8   : > { %1588 = vmatprep.subr.mxu0 %v1798_v3 }
 0x5b9   : > { %1589 = vmatpush3.msra.mxu0 %v1901_v4 }
 0x5ba   : > { %1590 = vmatprep.subr.mxu0 %v1798_v3 }
 0x5bb   : > { %1591 = vmatpush3.msra.mxu0 %v1913_v6 }
 0x5bc   : > { %1592 = vmatprep.subr.mxu0 %v1798_v3 }
 0x5bd   : > { %1593 = vmatpush3.msra.mxu0 %v1929_v8 }
 0x5be   : > { %1608 = vmatprep.subr.mxu0 %v1798_v3 }
 0x676   : > { %v692_v16 = vpop.f32.mrf.mxu0 }
 0x677   : > { %v696_v17 = vadd.f32 %v692_v16, %v375_v15 }
 0x678   : > { %v1574_v18 = vpop.f32.mrf.mxu0 }
 0x679   : > { %v697_v19 = vmul.f32 2.0, %v696_v17 }
 0x67b   : > { %v698_v21 = vsel %vm1966_vm5, %v697_v19, %v696_v17 }
 0x67c   : > { %v1441_v22 = vmul.f32 -1.442695, %v698_v21 }
 0x67e   : > { %1696 = vpow2.f32 %v1441_v22 }
 0x68b   : > { %v1697_v23 = vpop.eup %1696 }
 0x68c   : > { %v702_v24 = vadd.f32 1.0, %v1697_v23 }
 0x68e   : > { %1698 = vrcp.f32 %v702_v24 }
 0x69b   : > { %v1699_v25 = vpop.eup %1698 }
 0x69c   : > { %v705_v26 = vmul.f32 2.0, %v1699_v25 }
 0x69e   : > { %v1442_v27 = vadd.f32 -1.0, %v705_v26 }
 0x6a0   : > { %v707_v28 = vsel %vm1966_vm5, %v1442_v27, %v1699_v25 }
 0x6a1   : > { %710 = vrot.lane.b32.xlu0 %v707_v28, %s1800_s17  ;;  %v708_v31 = vmul.f32 %v707_v28, %v614_v56 }
 0x713   : > { %v711_v29 = vpop.permute.xlu0 %710 }
 0x714   : > { %v713_v30 = vmul.f32 %v711_v29, %v707_v28 }
 0x716   : > { %715 = vrot.lane.b32.xlu1 %v713_v30, %s1801_s18 }
 0x788   : > { %v716_v32 = vpop.permute.xlu1 %715 }
 0x789   : > { %v718_v33 = vadd.f32 %v716_v32, %v708_v31 }
 0x78b   : > { %1700 = vtanh.f32 %v718_v33 }
 0x798   : > { %v1701_v34 = vpop.eup %1700 }
 0x799   : > { %721 = vrot.lane.b32.xlu0 %v1701_v34, %s1800_s17 }
 0x80b   : > { %v722_v35 = vpop.permute.xlu0 %721 }
 0x80c   : > { %v724_v36 = vmul.f32 %v722_v35, %v707_v28  ;;  %v390_v28 = vadd.f32 %v2023_v10, %v1963_v14 }
 0x80e   : > { %726 = vrot.lane.b32.xlu1 %v724_v36, %s1801_s18 }
 0x880   : > { %v727_v37 = vpop.permute.xlu1 %726 }
 0x881   : > { %1584 = vmatmul.mubr.msk.f32.vlgmr.msra.gmra.mxu1 %vm412_vm6, %v727_v37 }
 0x882   : > { %1598 = vmatpush3.msra.mxu1 %v1895_v2  ;;  %1605 = vmatprep.mubr.msk.f32.mxu1 %vm1799_vm2, %v1798_v3 }
 0x883   : > { %1599 = vmatprep.subr.mxu1 %v1798_v3 }
 0x884   : > { %1600 = vmatpush3.msra.mxu1 %v1901_v4 }
 0x885   : > { %1601 = vmatprep.subr.mxu1 %v1798_v3 }
 0x886   : > { %1602 = vmatpush3.msra.mxu1 %v1913_v6 }
 0x887   : > { %1603 = vmatprep.subr.mxu1 %v1798_v3 }
 0x888   : > { %1604 = vmatpush3.msra.mxu1 %v1929_v8 }
 0x889   : > { %1619 = vmatprep.subr.mxu1 %v1798_v3 }
 0x941   : > { %v796_v39 = vpop.f32.mrf.mxu1 }
 0x942   : > { %v800_v40 = vadd.f32 %v796_v39, %v380_v38 }
 0x943   : > { %v1585_v41 = vpop.f32.mrf.mxu1 }
 0x944   : > { %v801_v42 = vmul.f32 2.0, %v800_v40 }
 0x946   : > { %v802_v43 = vsel %vm1966_vm5, %v801_v42, %v800_v40 }
 0x947   : > { %v1444_v44 = vmul.f32 -1.442695, %v802_v43 }
 0x949   : > { %1702 = vpow2.f32 %v1444_v44 }
 0x956   : > { %v1703_v45 = vpop.eup %1702 }
 0x957   : > { %v806_v46 = vadd.f32 1.0, %v1703_v45  ;;  %v395_v45 = vadd.f32 %v1963_v14, %v2029_v13 }
 0x959   : > { %1704 = vrcp.f32 %v806_v46 }
 0x966   : > { %v1705_v47 = vpop.eup %1704 }
 0x967   : > { %v809_v48 = vmul.f32 2.0, %v1705_v47 }
 0x969   : > { %v1445_v49 = vadd.f32 -1.0, %v809_v48 }
 0x96b   : > { %v811_v50 = vsel %vm1966_vm5, %v1445_v49, %v1705_v47 }
 0x96c   : > { %814 = vrot.lane.b32.xlu0 %v811_v50, %s1800_s17  ;;  %v812_v53 = vmul.f32 %v811_v50, %v718_v33 }
 0x9de   : > { %v815_v51 = vpop.permute.xlu0 %814 }
 0x9df   : > { %v817_v52 = vmul.f32 %v815_v51, %v811_v50 }
 0x9e1   : > { %819 = vrot.lane.b32.xlu1 %v817_v52, %s1801_s18 }
 0xa53   : > { %v820_v54 = vpop.permute.xlu1 %819 }
 0xa54   : > { %v822_v55 = vadd.f32 %v820_v54, %v812_v53 }
 0xa56   : > { %1706 = vtanh.f32 %v822_v55 }
 0xa63   : > { %v1707_v56 = vpop.eup %1706 }
 0xa64   : > { %825 = vrot.lane.b32.xlu0 %v1707_v56, %s1800_s17 }
 0xad6   : > { %v826_v57 = vpop.permute.xlu0 %825 }
 0xad7   : > { %v828_v58 = vmul.f32 %v826_v57, %v811_v50 }
 0xad9   : > { %830 = vrot.lane.b32.xlu1 %v828_v58, %s1801_s18 }
 0xb4b   : > { %v831_v59 = vpop.permute.xlu1 %830 }
 0xb4c   : > { %1595 = vmatmul.mubr.msk.f32.vlgmr.msra.gmra.mxu0 %vm412_vm6, %v831_v59 }
 0xb4d   : > { %1609 = vmatpush3.msra.mxu0 %v1895_v2  ;;  %1616 = vmatprep.mubr.msk.f32.mxu0 %vm1799_vm2, %v1798_v3 }
 0xb4e   : > { %1610 = vmatprep.subr.mxu0 %v1798_v3 }
 0xb4f   : > { %1611 = vmatpush3.msra.mxu0 %v1901_v4 }
 0xb50   : > { %1612 = vmatprep.subr.mxu0 %v1798_v3 }
 0xb51   : > { %1613 = vmatpush3.msra.mxu0 %v1913_v6 }
 0xb52   : > { %1614 = vmatprep.subr.mxu0 %v1798_v3 }
 0xb53   : > { %1615 = vmatpush3.msra.mxu0 %v1929_v8 }
 0xb54   : > { %1630 = vmatprep.subr.mxu0 %v1798_v3 }
 0xc0c   : > { %v900_v61 = vpop.f32.mrf.mxu0 }
 0xc0d   : > { %v904_v62 = vadd.f32 %v900_v61, %v385_v60 }
 0xc0e   : > { %v1596_v63 = vpop.f32.mrf.mxu0 }
 0xc0f   : > { %v905_v0 = vmul.f32 2.0, %v904_v62 }
 0xc11   : > { %v906_v1 = vsel %vm1966_vm5, %v905_v0, %v904_v62 }
 0xc12   : > { %v1447_v5 = vmul.f32 -1.442695, %v906_v1 }
 0xc14   : > { %1708 = vpow2.f32 %v1447_v5  ;;  %v400_v5 = vadd.f32 %v2027_v12, %v1963_v14 }
 0xc21   : > { %v1709_v7 = vpop.eup %1708 }
 0xc22   : > { %v910_v9 = vadd.f32 1.0, %v1709_v7 }
 0xc24   : > { %1710 = vrcp.f32 %v910_v9 }
 0xc31   : > { %v1711_v15 = vpop.eup %1710 }
 0xc32   : > { %v913_v16 = vmul.f32 2.0, %v1711_v15 }
 0xc34   : > { %v1448_v17 = vadd.f32 -1.0, %v913_v16 }
 0xc36   : > { %v915_v18 = vsel %vm1966_vm5, %v1448_v17, %v1711_v15 }
 0xc37   : > { %918 = vrot.lane.b32.xlu0 %v915_v18, %s1800_s17  ;;  %v916_v21 = vmul.f32 %v915_v18, %v822_v55 }
 0xca9   : > { %v919_v11 = vpop.permute.xlu0 %918 }
 0xcaa   : > { %v921_v19 = vmul.f32 %v919_v11, %v915_v18 }
 0xcac   : > { %923 = vrot.lane.b32.xlu1 %v921_v19, %s1801_s18 }
 0xd1e   : > { %v924_v22 = vpop.permute.xlu1 %923 }
 0xd1f   : > { %v926_v23 = vadd.f32 %v924_v22, %v916_v21 }
 0xd21   : > { %1712 = vtanh.f32 %v926_v23 }
 0xd2e   : > { %v1713_v24 = vpop.eup %1712 }
 0xd2f   : > { %929 = vrot.lane.b32.xlu0 %v1713_v24, %s1800_s17 }
 0xda1   : > { %v930_v25 = vpop.permute.xlu0 %929 }
 0xda2   : > { %v932_v26 = vmul.f32 %v930_v25, %v915_v18 }
 0xda4   : > { %934 = vrot.lane.b32.xlu1 %v932_v26, %s1801_s18 }
 0xe16   : > { %v935_v27 = vpop.permute.xlu1 %934 }
 0xe17   : > { %1606 = vmatmul.mubr.msk.f32.vlgmr.msra.gmra.mxu1 %vm412_vm6, %v935_v27 }
 0xe18   : > { %1620 = vmatpush3.msra.mxu1 %v1895_v2  ;;  %1627 = vmatprep.mubr.msk.f32.mxu1 %vm1799_vm2, %v1798_v3 }
 0xe19   : > { %1621 = vmatprep.subr.mxu1 %v1798_v3 }
 0xe1a   : > { %1622 = vmatpush3.msra.mxu1 %v1901_v4 }
 0xe1b   : > { %1623 = vmatprep.subr.mxu1 %v1798_v3 }
 0xe1c   : > { %1624 = vmatpush3.msra.mxu1 %v1913_v6 }
 0xe1d   : > { %1625 = vmatprep.subr.mxu1 %v1798_v3 }
 0xe1e   : > { %1626 = vmatpush3.msra.mxu1 %v1929_v8 }
 0xed7   : > { %v1004_v29 = vpop.f32.mrf.mxu1 }
 0xed8   : > { %v1008_v2 = vadd.f32 %v1004_v29, %v390_v28  ;;  %v1248_v28 = vld [vmem:[%s2185_s4 + $0x18] sm:$0xff]  ;;  %v1247_v29 = vld [vmem:[%s2185_s4 + $0x10] sm:$0xff] }
 0xed9   : > { %v1607_v30 = vpop.f32.mrf.mxu1 }
 0xeda   : > { %v1009_v31 = vmul.f32 2.0, %v1008_v2 }
 0xedc   : > { %v1010_v32 = vsel %vm1966_vm5, %v1009_v31, %v1008_v2  ;;  %v1245_v2 = vld [vmem:[%s2185_s4] sm:$0xff] }
 0xedd   : > { %v1450_v33 = vmul.f32 -1.442695, %v1010_v32 }
 0xedf   : > { %1714 = vpow2.f32 %v1450_v33 }
 0xeec   : > { %v1715_v4 = vpop.eup %1714 }
 0xeed   : > { %v1014_v34 = vadd.f32 1.0, %v1715_v4  ;;  %v1458_v4 = vld [vmem:[%s2186_s5] ss:$0 sm:$0xff] }
 0xeef   : > { %1716 = vrcp.f32 %v1014_v34 }
 0xefc   : > { %v1717_v6 = vpop.eup %1716 }
 0xefd   : > { %v1017_v35 = vmul.f32 2.0, %v1717_v6 }
 0xeff   : > { %v1451_v36 = vadd.f32 -1.0, %v1017_v35 }
 0xf01   : > { %v1019_v8 = vsel %vm1966_vm5, %v1451_v36, %v1717_v6 }
 0xf02   : > { %1022 = vrot.lane.b32.xlu0 %v1019_v8, %s1800_s17  ;;  %v1020_v38 = vmul.f32 %v1019_v8, %v926_v23 }
 0xf74   : > { %v1023_v10 = vpop.permute.xlu0 %1022 }
 0xf75   : > { %v1025_v37 = vmul.f32 %v1023_v10, %v1019_v8 }
 0xf77   : > { %1027 = vrot.lane.b32.xlu1 %v1025_v37, %s1801_s18 }
 0xfe9   : > { %v1028_v39 = vpop.permute.xlu1 %1027 }
 0xfea   : > { %v1030_v40 = vadd.f32 %v1028_v39, %v1020_v38 }
 0xfec   : > { %1718 = vtanh.f32 %v1030_v40 }
 0xff9   : > { %v1719_v41 = vpop.eup %1718 }
 0xffa   : > { %1033 = vrot.lane.b32.xlu0 %v1719_v41, %s1800_s17 }
0x106c   : > { %v1034_v42 = vpop.permute.xlu0 %1033 }
0x106d   : > { %v1036_v43 = vmul.f32 %v1034_v42, %v1019_v8 }
0x106f   : > { %1038 = vrot.lane.b32.xlu1 %v1036_v43, %s1801_s18 }
0x10e1   : > { %v1039_v44 = vpop.permute.xlu1 %1038 }
0x10e2   : > { %1617 = vmatmul.mubr.msk.f32.vlgmr.msra.gmra.mxu0 %vm412_vm6, %v1039_v44 }
0x10e3   : > { %1638 = vmatprep.mubr.msk.f32.mxu0 %vm1799_vm2, %v1798_v3  ;;  %1631 = vmatpush3.msra.mxu0 %v1248_v28 }
0x10e4   : > { %1632 = vmatprep.subr.mxu0 %v1798_v3 }
0x10e5   : > { %1633 = vmatpush3.msra.mxu0 %v1247_v29 }
0x10e6   : > { %1634 = vmatprep.subr.mxu0 %v1798_v3 }
0x10e7   : > { %1635 = vmatpush3.msra.mxu0 %v1246_v20 }
0x10e8   : > { %1636 = vmatprep.subr.mxu0 %v1798_v3 }
0x10e9   : > { %1637 = vmatpush3.msra.mxu0 %v1245_v2 }
0x11a2   : > { %v1108_v46 = vpop.f32.mrf.mxu0 }
0x11a3   : > { %v1112_v47 = vadd.f32 %v1108_v46, %v395_v45 }
0x11a4   : > { %v1618_v48 = vpop.f32.mrf.mxu0 }
0x11a5   : > { %v1113_v49 = vmul.f32 2.0, %v1112_v47 }
0x11a7   : > { %v1114_v50 = vsel %vm1966_vm5, %v1113_v49, %v1112_v47 }
0x11a8   : > { %v1453_v51 = vmul.f32 -1.442695, %v1114_v50 }
0x11aa   : > { %1720 = vpow2.f32 %v1453_v51 }
0x11b7   : > { %v1721_v52 = vpop.eup %1720 }
0x11b8   : > { %v1118_v53 = vadd.f32 1.0, %v1721_v52 }
0x11ba   : > { %1722 = vrcp.f32 %v1118_v53 }
0x11c7   : > { %v1723_v54 = vpop.eup %1722 }
0x11c8   : > { %v1121_v55 = vmul.f32 2.0, %v1723_v54 }
0x11ca   : > { %v1454_v56 = vadd.f32 -1.0, %v1121_v55 }
0x11cc   : > { %v1123_v57 = vsel %vm1966_vm5, %v1454_v56, %v1723_v54 }
0x11cd   : > { %1126 = vrot.lane.b32.xlu0 %v1123_v57, %s1800_s17  ;;  %v1124_v59 = vmul.f32 %v1123_v57, %v1030_v40 }
0x123f   : > { %v1127_v13 = vpop.permute.xlu0 %1126 }
0x1240   : > { %v1129_v58 = vmul.f32 %v1127_v13, %v1123_v57 }
0x1242   : > { %1131 = vrot.lane.b32.xlu1 %v1129_v58, %s1801_s18 }
0x12b4   : > { %v1132_v60 = vpop.permute.xlu1 %1131 }
0x12b5   : > { %v1134_v61 = vadd.f32 %v1132_v60, %v1124_v59 }
0x12b7   : > { %1724 = vtanh.f32 %v1134_v61 }
0x12c4   : > { %v1725_v62 = vpop.eup %1724 }
0x12c5   : > { %1137 = vrot.lane.b32.xlu0 %v1725_v62, %s1800_s17 }
0x1337   : > { %v1138_v63 = vpop.permute.xlu0 %1137 }
0x1338   : > { %v1140_v0 = vmul.f32 %v1138_v63, %v1123_v57 }
0x133a   : > { %1142 = vrot.lane.b32.xlu1 %v1140_v0, %s1801_s18 }
0x13ac   : > { %v1143_v1 = vpop.permute.xlu1 %1142 }
0x13ad   : > { %1628 = vmatmul.mubr.msk.f32.vlgmr.msra.gmra.mxu1 %vm412_vm6, %v1143_v1 }
0x146d   : > { %v1212_v7 = vpop.f32.mrf.mxu1 }
0x146e   : > { %v1216_v9 = vadd.f32 %v1212_v7, %v400_v5 }
0x146f   : > { %v1629_v15 = vpop.f32.mrf.mxu1 }
0x1470   : > { %v1217_v16 = vmul.f32 2.0, %v1216_v9 }
0x1472   : > { %v1218_v17 = vsel %vm1966_vm5, %v1217_v16, %v1216_v9 }
0x1473   : > { %v1456_v18 = vmul.f32 -1.442695, %v1218_v17 }
0x1475   : > { %1726 = vpow2.f32 %v1456_v18 }
0x1482   : > { %v1727_v11 = vpop.eup %1726 }
0x1483   : > { %v1222_v19 = vadd.f32 1.0, %v1727_v11 }
0x1485   : > { %1728 = vrcp.f32 %v1222_v19 }
0x1492   : > { %v1729_v21 = vpop.eup %1728 }
0x1493   : > { %v1225_v22 = vmul.f32 2.0, %v1729_v21 }
0x1495   : > { %v1457_v23 = vadd.f32 -1.0, %v1225_v22 }
0x1497   : > { %v1227_v24 = vsel %vm1966_vm5, %v1457_v23, %v1729_v21 }
0x1498   : > { %1230 = vrot.lane.b32.xlu0 %v1227_v24, %s1800_s17  ;;  %v1228_v25 = vmul.f32 %v1227_v24, %v1134_v61 }
0x150a   : > { %v1231_v14 = vpop.permute.xlu0 %1230 }
0x150b   : > { %v1233_v12 = vmul.f32 %v1231_v14, %v1227_v24 }
0x150d   : > { %1235 = vrot.lane.b32.xlu1 %v1233_v12, %s1801_s18 }
0x157f   : > { %v1236_v26 = vpop.permute.xlu1 %1235 }
0x1580   : > { %v1238_v27 = vadd.f32 %v1236_v26, %v1228_v25 }
0x1582   : > { %1730 = vtanh.f32 %v1238_v27 }
0x158f   : > { %v1731_v30 = vpop.eup %1730 }
0x1590   : > { %1241 = vrot.lane.b32.xlu0 %v1731_v30, %s1800_s17  ;;  %s244_s17 = scalar_lea.vmem [#allocation2], %s1422_s15 }
0x1602   : > { %v1242_v31 = vpop.permute.xlu0 %1241 }
0x1603   : > { %v1244_v32 = vmul.f32 %v1242_v31, %v1227_v24 }
0x1605   : > { %1257 = vrot.lane.b32.xlu1 %v1244_v32, %s1801_s18  ;;  %s1359_s18 = sshll.u32 %s244_s17, 4  ;;  %s1360_s18 = int_to_ptr.vmem [resolvable:$true] %s1359_s18 }
0x1606   : > { %s1736_s29 = scalar_lea.vmem %s1360_s18, 128  ;;  %p1743_p0 = scmp.lt.s32.totalorder %s1360_s18, %s1741_s10 }
0x1607   : > { %p1737_p11 = scmp.ne.s32.totalorder %s1360_s18, %s1736_s29  ;;  %p1744_p1 = scmp.lt.s32.totalorder %s1742_s25, %s1736_s29 }
0x1609   : > { %p1738_p12 = pnand %p1737_p11, %p1876_p5  ;;  %p1745_p2 = por %p1744_p1, %p1743_p0 }
0x160b   : > { %p1739_p13 = pneg %p1738_p12 }
0x160d   : > { %p1746_p3 = pnand %p1745_p2, %p1739_p13 }
0x1677   : > { %v1258_v33 = vpop.permute.xlu1 %1257 }
0x1678   : > { %1639 = vmatmul.mubr.msk.f32.vlgmr.msra.gmra.mxu0 %vm412_vm6, %v1258_v33 }
0x1738   : > { %v1327_v34 = vpop.f32.mrf.mxu0 }
0x1739   : > { %v1328_v6 = vadd.f32 %v1458_v4, %v1327_v34 }
0x173a   : > { %v1640_v35 = vpop.f32.mrf.mxu0 }
0x173b   : > { %v1331_v3 = vsel %vm269_vm1, %v1328_v6, -inf }
0x173c   : > { %1332 = vmax.xlane.f32.xlu0 %v1331_v3 }
0x17c5   : > { %v1333_v36 = vpop.xlane.xlu0 %1332 }
0x17c6   : > { %v1334_v8 = vsub.f32 %v1328_v6, %v1333_v36 }
0x17c8   : > { %v1335_v10 = vmul.f32 1.442695, %v1334_v8 }
0x17ca   : > { %1732 = vpow2.f32 %v1335_v10 }
0x17d7   : > { %v1733_v37 = vpop.eup %1732 }
0x17d8   : > { %v1337_v38 = vsel %vm269_vm1, %v1733_v37, 0.0 }
0x17d9   : > { %1338 = vadd.xlane.f32.xlu1 %v1337_v38 }
0x1862   : > { %v1339_v39 = vpop.xlane.xlu1 %1338 }
0x1863   : > { %1734 = vlog2.f32 %v1339_v39 }
0x1870   : > { %v1735_v40 = vpop.eup %1734 }
0x1871   : > { %v1341_v41 = vmul.f32 0.6931472, %v1735_v40 }
0x1873   : > { %v1342_v42 = vadd.f32 %v1341_v41, %v1333_v36 }
0x1875   : > { %v1343_v43 = vsub.f32 %v1328_v6, %v1342_v42 }
0x1877   : > { %1344 = vst.msk [vmem:[%s244_s17] sm:$0xff] %vm269_vm1, %v1343_v43 }
0x1878   : > { %1749 = shalt.err (!%p1746_p3)
}
0x1879   : > { %s1750_s11 = scalar_lea.hbm %s1357_s26, 128  ;;  %s1754_s14 = scalar_lea.hbm %s2187_s6, 256 }
0x187a   : > { %p1751_p4 = scmp.ne.s32.totalorder %s1357_s26, %s1750_s11  ;;  %p1755_p9 = scmp.lt.s32.totalorder %s1357_s26, %s2187_s6 }
0x187b   : > { %p1756_p10 = scmp.lt.s32.totalorder %s1754_s14, %s1750_s11 }
0x187c   : > { %p1752_p7 = pnand %p1751_p4, %p1876_p5 }
0x187d   : > { %p1757_p11 = por %p1756_p10, %p1755_p9 }
0x187e   : > { %p1753_p8 = pneg %p1752_p7 }
0x1880   : > { %p1758_p12 = pnand %p1757_p11, %p1753_p8 }
0x1882   : > { %1761 = shalt.err (!%p1758_p12)
}
0x1883   : > { %1641 = dma.vmem_to_hbm [thread:$0]  (%p1876_p5), %s1360_s18, 128, %s1357_s26, %s1346_s28  }
0x1884 PF: > { %p1647_p13 = scmp.ge.s32.totalorder %s1796_s24, 2  ;;  %s1371_s17 = sand.u32 1, %s1784_s21  }
0x1885   : > { %s1372_s19 = scalar_lea.sflag [#allocation3], %s1371_s17 }
0x1886   : > { %p1644_p0 = pnand %p1647_p13, %p1880_p6 }
0x1888   : > { %p1645_p1 = pneg %p1644_p0 }
0x188a   : > { %1779 = dma.done.wait (%p1645_p1), %s1372_s19, 128  }
0x188b   : > { %1781 = vsyncadd (%p1645_p1), %s1372_s19, 4294967168  ;;  %p16_p2 = scmp.ge.s32.totalorder %s1863_s27, 4   ;;  %s2192_s21 = smov %s1788_s22 }
0x188c   : > { %s2193_s22 = smov %s1792_s23  ;;  %s2194_s23 = smov %s1874_s30 }
0x188d   : > { %s2195_s24 = smov %s1863_s27  ;;  %18 = sbr.rel (!%p16_p2) target bundleno = 3 (0x3), region = 79 }
0x1892   :  { %1377 = vsyncpa [#allocation3], 1 }
0x1893   :  { %1379 = vsyncpa [#allocation3 + $0x1], 1 }

</bundles_post_ra>
